<compile_context>
chip_gen: v6e
topology: v6e:2x2x1
jax: 0.10.0
libtpu: 0.0.40
codegen_flags: <defaults>
</compile_context>

<pallas_src>
import jax
import jax.numpy as jnp
from jax.experimental import pallas as pl
from jax.experimental.pallas import tpu as pltpu


def _make_kernel(tm, n_rows, tiles_per_core, weighted):
    """Kernel over (tm, HW) row tiles of the flattened (B*J, HW) heatmaps."""

    def kernel(*refs):
        if weighted:
            pred_ref, gt_ref, w_ref, out_ref = refs
        else:
            pred_ref, gt_ref, out_ref = refs
            w_ref = None

        c = pl.program_id(0)   # core / parallel split
        i = pl.program_id(1)   # row-tile within this core's range

        @pl.when(i == 0)
        def _():
            out_ref[...] = jnp.zeros_like(out_ref)

        # Keep native dtype through the DMA; upcast in-kernel (free VPU op).
        pred = pred_ref[...].astype(jnp.float32)   # (tm, HW)
        gt = gt_ref[...].astype(jnp.float32)       # (tm, HW)
        diff = pred - gt
        if weighted:
            diff = diff * w_ref[...].astype(jnp.float32)   # (tm, 1) broadcast over HW

        # Mask rows outside the true row range (partial last tile or fully-duplicated
        # tiles produced by the per-core grid split / index-map clamp).
        row_start = (c * tiles_per_core + i) * tm
        row_ids = row_start + jax.lax.broadcasted_iota(jnp.int32, (tm, 1), 0)
        diff = jnp.where(row_ids < n_rows, diff, 0.0)

        sq = diff * diff   # (tm, HW) f32

        # Fold tm rows into an 8-row accumulator slab: pure VPU adds; the final
        # cross-lane/core reduce and the /(B*HW) are hoisted to the wrapper.
        acc = sq[0:8, :]
        for r in range(1, tm // 8):
            acc = acc + sq[r * 8:(r + 1) * 8, :]
        out_ref[0] += acc

    return kernel


def joints_mse_loss(output, target, target_weight=None, use_target_weight=True, tm=None):
    """output, target: (B, J, H, W); target_weight: (B, J, 1). Returns scalar f32 loss."""
    B, J, H, W = output.shape
    HW = H * W
    N = B * J

    # Reshape only — contiguous views, no transpose, no cast => no extra HBM traffic.
    pred = output.reshape(N, HW)
    gt = target.reshape(N, HW)

    weighted = bool(use_target_weight)
    if weighted:
        w = target_weight.reshape(N, 1)

    itemsize = jnp.dtype(output.dtype).itemsize

    # Row-tile size: multiple of 8, big enough (few MiB of block bytes) to amortize
    # per-grid-step overhead, capped so 2 inputs x 2 buffers stay well inside the
    # scoped VMEM on all generations (incl. v7x's smaller VMEM).
    if tm is None:
        target_block_bytes = 2 * 1024 * 1024
        tm_cap = max(8, min(512, (target_block_bytes // max(1, HW * itemsize)) // 8 * 8))
        tm = min(tm_cap, pl.cdiv(N, 8) * 8)
    tm = max(8, (tm // 8) * 8)

    num_tiles = pl.cdiv(N, tm)
    n_cores = 2 if num_tiles > 1 else 1          # shard row tiles across v7x's 2 TCs
    tiles_per_core = pl.cdiv(num_tiles, n_cores)

    def row_map(c, i):
        # Clamp so over-allocated per-core tiles re-read the last valid tile; their
        # contribution is zeroed by the in-kernel row mask.
        return (jnp.minimum(c * tiles_per_core + i, num_tiles - 1), 0)

    in_specs = [
        pl.BlockSpec((tm, HW), row_map),
        pl.BlockSpec((tm, HW), row_map),
    ]
    args = [pred, gt]
    if weighted:
        in_specs.append(pl.BlockSpec((tm, 1), row_map))
        args.append(w)

    out_specs = pl.BlockSpec((1, 8, HW), lambda c, i: (c, 0, 0))

    w_bytes = (N * jnp.dtype(target_weight.dtype).itemsize) if weighted else 0
    cost = pl.CostEstimate(
        flops=5 * N * HW,
        transcendentals=0,
        bytes_accessed=2 * N * HW * itemsize + w_bytes + n_cores * 8 * HW * 4,
    )

    partials = pl.pallas_call(
        _make_kernel(tm, N, tiles_per_core, weighted),
        out_shape=jax.ShapeDtypeStruct((n_cores, 8, HW), jnp.float32),
        grid_spec=pltpu.PrefetchScalarGridSpec(
            num_scalar_prefetch=0,
            grid=(n_cores, tiles_per_core),
            in_specs=in_specs,
            out_specs=out_specs,
        ),
        compiler_params=pltpu.CompilerParams(
            dimension_semantics=("parallel", "arbitrary"),
        ),
        cost_estimate=cost,
    )(*args)

    # Single cross-lane/core reduce + single divide by B*HW (the per-joint MSE divisor).
    return jnp.sum(partials) / jnp.float32(B * HW)


def _reference(output, target, target_weight, use_target_weight=True):
    B, J, H, W = output.shape
    pred = output.reshape(B, J, -1).astype(jnp.float32)
    gt = target.reshape(B, J, -1).astype(jnp.float32)
    loss = jnp.float32(0.0)
    for idx in range(J):
        p = pred[:, idx, :]
        g = gt[:, idx, :]
        if use_target_weight:
            wgt = target_weight[:, idx].astype(jnp.float32)  # (B, 1)
            p = p * wgt
            g = g * wgt
        loss = loss + jnp.mean((p - g) ** 2)
    return loss


if __name__ == "__main__":
    key = jax.random.PRNGKey(0)
    k1, k2, k3 = jax.random.split(key, 3)

    B, J, H, W = 2, 4, 16, 16
    output = jax.random.normal(k1, (B, J, H, W), dtype=jnp.float32)
    target = jax.random.normal(k2, (B, J, H, W), dtype=jnp.float32)
    target_weight = jax.random.uniform(k3, (B, J, 1), dtype=jnp.float32)

    # Case 1: weighted, auto tile size (single row tile).
    loss = jax.block_until_ready(joints_mse_loss(output, target, target_weight, True))
    ref = _reference(output, target, target_weight, True)
    assert jnp.allclose(loss, ref, rtol=1e-5, atol=1e-6), (loss, ref)

    # Case 2: unweighted path — no weight input, no multiply.
    loss2 = jax.block_until_ready(joints_mse_loss(output, target, None, False))
    ref2 = _reference(output, target, target_weight, False)
    assert jnp.allclose(loss2, ref2, rtol=1e-5, atol=1e-6), (loss2, ref2)

    # Case 3: force small tiles to exercise the multi-tile / 2-core split and the
    # partial-tile row masking (N = 15 rows, tm = 8).
    B3, J3 = 3, 5
    o3 = jax.random.normal(k1, (B3, J3, H, W), dtype=jnp.float32)
    t3 = jax.random.normal(k2, (B3, J3, H, W), dtype=jnp.float32)
    tw3 = jax.random.uniform(k3, (B3, J3, 1), dtype=jnp.float32)
    loss3 = jax.block_until_ready(joints_mse_loss(o3, t3, tw3, True, tm=8))
    ref3 = _reference(o3, t3, tw3, True)
    assert jnp.allclose(loss3, ref3, rtol=1e-5, atol=1e-6), (loss3, ref3)

    print("KERNEL_OK")
</pallas_src>

<mosaic_0001>
module attributes {stable_mosaic.version = 11 : i64} {
  func.func @kernel(%arg0: i32, %arg1: i32, %arg2: memref<8x256xf32, #tpu.memory_space<vmem>>, %arg3: memref<8x256xf32, #tpu.memory_space<vmem>>, %arg4: memref<8x1xf32, #tpu.memory_space<vmem>>, %arg5: memref<1x8x256xf32, #tpu.memory_space<vmem>>) attributes {dimension_semantics = [#tpu.dimension_semantics<parallel>, #tpu.dimension_semantics<arbitrary>], iteration_bounds = array<i64: 1, 1>, scalar_prefetch = 0 : i64, scratch_operands = 0 : i64, tpu.core_type = #tpu.core_type<tc>, window_params = [{transform_indices = @transform_0, window_bounds = array<i64: 8, 256>}, {transform_indices = @transform_1, window_bounds = array<i64: 8, 256>}, {transform_indices = @transform_2, window_bounds = array<i64: 8, 1>}, {transform_indices = @transform_3, window_bounds = array<i64: 1, 8, 256>}]} {
    %c0_i32 = arith.constant 0 : i32
    %0 = arith.cmpi eq, %arg1, %c0_i32 : i32
    %1 = arith.extui %0 : i1 to i32
    %c0_i32_0 = arith.constant 0 : i32
    %2 = arith.cmpi ne, %1, %c0_i32_0 : i32
    scf.if %2 {
      %cst_13 = arith.constant 0.000000e+00 : f32
      %28 = vector.broadcast %cst_13 : f32 to vector<1x8x256xf32>
      %c0_14 = arith.constant 0 : index
      %c0_15 = arith.constant 0 : index
      %c0_16 = arith.constant 0 : index
      %29 = vector.load %arg5[%c0_14, %c0_15, %c0_16] : memref<1x8x256xf32, #tpu.memory_space<vmem>>, vector<1x8x256xf32>
      tpu.vector_store %arg5[%c0_14, %c0_15, %c0_16], %28 {strides = array<i32>} : memref<1x8x256xf32, #tpu.memory_space<vmem>>, vector<1x8x256xf32>,
    } else {
    }
    %c0 = arith.constant 0 : index
    %c0_1 = arith.constant 0 : index
    %3 = vector.load %arg2[%c0, %c0_1] : memref<8x256xf32, #tpu.memory_space<vmem>>, vector<8x256xf32>
    %c0_2 = arith.constant 0 : index
    %c0_3 = arith.constant 0 : index
    %4 = vector.load %arg3[%c0_2, %c0_3] : memref<8x256xf32, #tpu.memory_space<vmem>>, vector<8x256xf32>
    %5 = arith.subf %3, %4 : vector<8x256xf32>
    %c0_4 = arith.constant 0 : index
    %c0_5 = arith.constant 0 : index
    %6 = vector.load %arg4[%c0_4, %c0_5] : memref<8x1xf32, #tpu.memory_space<vmem>>, vector<8x1xf32>
    %7 = vector.broadcast %6 : vector<8x1xf32> to vector<8x256xf32>
    %8 = arith.mulf %5, %7 : vector<8x256xf32>
    %c1_i32 = arith.constant 1 : i32
    %9 = arith.muli %arg0, %c1_i32 : i32
    %10 = arith.addi %9, %arg1 : i32
    %c8_i32 = arith.constant 8 : i32
    %11 = arith.muli %10, %c8_i32 : i32
    %12 = tpu.iota {dimensions = array<i32: 0>} : vector<8x1xi32>
    %13 = vector.broadcast %11 : i32 to vector<8x1xi32>
    %14 = arith.addi %13, %12 : vector<8x1xi32>
    %c8_i32_6 = arith.constant 8 : i32
    %15 = vector.broadcast %c8_i32_6 : i32 to vector<8x1xi32>
    %16 = arith.cmpi slt, %14, %15 : vector<8x1xi32>
    %cst = arith.constant 0.000000e+00 : f32
    %17 = vector.shape_cast %16 : vector<8x1xi1> to vector<8x1xi1>
    %18 = vector.broadcast %17 : vector<8x1xi1> to vector<8x256xi1>
    %19 = vector.broadcast %cst : f32 to vector<8x256xf32>
    %20 = arith.select %18, %8, %19 : vector<8x256xi1>, vector<8x256xf32>
    %21 = arith.mulf %20, %20 : vector<8x256xf32>
    %c0_7 = arith.constant 0 : index
    %c0_8 = arith.constant 0 : index
    %c0_9 = arith.constant 0 : index
    %22 = vector.load %arg5[%c0_7, %c0_8, %c0_9] : memref<1x8x256xf32, #tpu.memory_space<vmem>>, vector<1x8x256xf32>
    %23 = vector.shape_cast %22 : vector<1x8x256xf32> to vector<8x256xf32>
    %24 = arith.addf %23, %21 : vector<8x256xf32>
    %c0_10 = arith.constant 0 : index
    %c0_11 = arith.constant 0 : index
    %c0_12 = arith.constant 0 : index
    %25 = vector.load %arg5[%c0_10, %c0_11, %c0_12] : memref<1x8x256xf32, #tpu.memory_space<vmem>>, vector<1x8x256xf32>
    %26 = vector.shape_cast %25 : vector<1x8x256xf32> to vector<8x256xf32>
    %27 = vector.shape_cast %24 : vector<8x256xf32> to vector<1x8x256xf32>
    tpu.vector_store %arg5[%c0_10, %c0_11, %c0_12], %27 {strides = array<i32>} : memref<1x8x256xf32, #tpu.memory_space<vmem>>, vector<1x8x256xf32>,
    return
  }
  func.func @transform_0(%arg0: i32, %arg1: i32) -> (i32, i32) {
    %c1_i32 = arith.constant 1 : i32
    %0 = arith.muli %arg0, %c1_i32 : i32
    %1 = arith.addi %0, %arg1 : i32
    %c0_i32 = arith.constant 0 : i32
    %2 = arith.minsi %1, %c0_i32 : i32
    %c0_i32_0 = arith.constant 0 : i32
    %c0_i32_1 = arith.constant 0 : i32
    return %2, %c0_i32_0 : i32, i32
  }
  func.func @transform_1(%arg0: i32, %arg1: i32) -> (i32, i32) {
    %c1_i32 = arith.constant 1 : i32
    %0 = arith.muli %arg0, %c1_i32 : i32
    %1 = arith.addi %0, %arg1 : i32
    %c0_i32 = arith.constant 0 : i32
    %2 = arith.minsi %1, %c0_i32 : i32
    %c0_i32_0 = arith.constant 0 : i32
    %c0_i32_1 = arith.constant 0 : i32
    return %2, %c0_i32_0 : i32, i32
  }
  func.func @transform_2(%arg0: i32, %arg1: i32) -> (i32, i32) {
    %c1_i32 = arith.constant 1 : i32
    %0 = arith.muli %arg0, %c1_i32 : i32
    %1 = arith.addi %0, %arg1 : i32
    %c0_i32 = arith.constant 0 : i32
    %2 = arith.minsi %1, %c0_i32 : i32
    %c0_i32_0 = arith.constant 0 : i32
    %c0_i32_1 = arith.constant 0 : i32
    return %2, %c0_i32_0 : i32, i32
  }
  func.func @transform_3(%arg0: i32, %arg1: i32) -> (i32, i32, i32) {
    %c0_i32 = arith.constant 0 : i32
    %c0_i32_0 = arith.constant 0 : i32
    %c0_i32_1 = arith.constant 0 : i32
    return %arg0, %c0_i32, %c0_i32_0 : i32, i32, i32
  }
}

</mosaic_0001>

<bundles_post_ra>
// kernel: tpu_custom_call.1
= control target key start
LH: loop header
LB: loop body
LE: loop exit
PB: predicated region body
PF: predicated region fallthrough
CT: control target
= control target key end

     0   :  { %8 = vsyncpa [#allocation3], 0  ;;  %s257_s0 = inlined_call_operand.hbm [shape: f32[8,256], index: 0, kind: input, shape index: {}]   ;;  %s258_s1 = inlined_call_operand.hbm [shape: f32[8,256], index: 1, kind: input, shape index: {}]   ;;  %s259_s2 = inlined_call_operand.vmem [shape: f32[8,1], index: 2, kind: input, shape index: {}]   ;;  %s260_s3 = inlined_call_operand.hbm [shape: f32[1,8,256], index: 3, kind: output, shape index: {}]  }
   0x1   :  { %9 = vsyncpa [#allocation6], 0 }
   0x2   :  { %10 = vsyncpa [#allocation4], 0  ;;  %s221_s12 = smov [#allocation2]   ;;  %s222_s14 = smov [#allocation5]  }
   0x3   :  { %s23_s13 = sshll.u32 %s221_s12, 4  ;;  %s39_s15 = sshll.u32 %s222_s14, 4  ;;  %s24_s13 = int_to_ptr.vmem [resolvable:$true] %s23_s13  ;;  %s40_s15 = int_to_ptr.vmem [resolvable:$true] %s39_s15 }
   0x4   :  { %s163_s16 = scalar_lea.vmem %s24_s13, 256  ;;  %p168_p1 = scmp.lt.s32.totalorder %s24_s13, %s24_s13 }
   0x5   :  { %p164_p0 = scmp.ne.s32.totalorder %s24_s13, %s163_s16  ;;  %p169_p2 = scmp.lt.s32.totalorder %s163_s16, %s163_s16 }
   0x7   :  { %p170_p3 = por %p169_p2, %p168_p1 }
   0x9   :  { %p171_p4 = pnand %p170_p3, %p164_p0 }
   0xb   :  { %174 = shalt.err (!%p171_p4)
}
   0xc   :  { %26 = dma.hbm_to_vmem [thread:$0]  %s257_s0, 256, %s24_s13, [#allocation3]  }
   0xd   :  { %s183_s19 = scalar_lea.vmem %s40_s15, 256  ;;  %p188_p6 = scmp.lt.s32.totalorder %s40_s15, %s40_s15 }
   0xe   :  { %p184_p5 = scmp.ne.s32.totalorder %s40_s15, %s183_s19  ;;  %p189_p7 = scmp.lt.s32.totalorder %s183_s19, %s183_s19 }
  0x10   :  { %p190_p8 = por %p189_p7, %p188_p6 }
  0x12   :  { %p191_p9 = pnand %p190_p8, %p184_p5 }
  0x14   :  { %194 = shalt.err (!%p191_p9)
}
  0x15   :  { %42 = dma.hbm_to_vmem [thread:$0]  %s258_s1, 256, %s40_s15, [#allocation6]  }
  0x16   :  { %215 = dma.done.wait [#allocation3], 256  }
  0x17   :  { %216 = vsyncadd [#allocation3], 4294967040 }
  0x18   :  { %217 = dma.done.wait [#allocation6], 256  }
  0x19   :  { %218 = vsyncadd [#allocation6], 4294967040  ;;  %v223_v0 = vmov 0   ;;  %v96_v1 = vld [vmem:[%s259_s2] sm:$0xff]  ;;  %v91_v3 = vld [vmem:[#allocation2 + $0x8] sm:$0xff]  ;;  %s224_s0 = smov [#allocation7]  }
  0x1a   :  { %154 = vset.pattern.permute.xlu0 %v223_v0  ;;  %v90_v2 = vld [vmem:[#allocation2] sm:$0xff]  ;;  %v92_v4 = vld [vmem:[#allocation5] sm:$0xff]  ;;  %v93_v5 = vld [vmem:[#allocation5 + $0x8] sm:$0xff]  ;;  %s129_s1 = sshll.u32 %s224_s0, 4  ;;  %s130_s1 = int_to_ptr.vmem [resolvable:$true] %s129_s1 }
  0x1b   :  { %99 = vperm.xlu0 %154, %v96_v1   ;;  %v94_v6 = vsub.f32 %v90_v2, %v92_v4  ;;  %v95_v7 = vsub.f32 %v91_v3, %v93_v5  ;;  %s195_s24 = scalar_lea.vmem %s130_s1, 256  ;;  %p200_p11 = scmp.lt.s32.totalorder %s130_s1, %s130_s1 }
  0x1c   :  { %p196_p10 = scmp.ne.s32.totalorder %s130_s1, %s195_s24  ;;  %p201_p12 = scmp.lt.s32.totalorder %s195_s24, %s195_s24 }
  0x1e   :  { %p202_p13 = por %p201_p12, %p200_p11 }
  0x20   :  { %p203_p0 = pnand %p202_p13, %p196_p10 }
  0x96   :  { %v100_v8 = vpop.permute.xlu0 %99 }
  0x97   :  { %v102_v9 = vmul.f32 %v100_v8, %v94_v6  ;;  %v103_v10 = vmul.f32 %v100_v8, %v95_v7 }
  0x99   :  { %v115_v11 = vmul.f32 %v102_v9, %v102_v9  ;;  %v116_v12 = vmul.f32 %v103_v10, %v103_v10 }
  0x9b   :  { %121 = vst [vmem:[#allocation7] sm:$0xff] %v115_v11  ;;  %122 = vst [vmem:[#allocation7 + $0x8] sm:$0xff] %v116_v12 }
  0x9c   :  { %206 = shalt.err (!%p203_p0)
}
  0x9d   :  { %132 = dma.vmem_to_hbm [thread:$0]  %s130_s1, 256, %s260_s3, [#allocation4]  }
  0x9e   :  { %219 = dma.done.wait [#allocation4], 256  }
  0x9f   :  { %220 = vsyncadd [#allocation4], 4294967040 }
  0xa0   :  { %136 = vsyncpa [#allocation3], 1 }
  0xa1   :  { %137 = vsyncpa [#allocation6], 1 }
  0xa2   :  { %138 = vsyncpa [#allocation4], 1 }

</bundles_post_ra>
